<compile_context>
chip_gen: v7x
topology: tpu7x:2x2x1
jax: 0.10.0
libtpu: 0.0.40
codegen_flags: <defaults>
</compile_context>

<pallas_src>
import jax
import jax.numpy as jnp
from jax.experimental import pallas as pl
from jax.experimental.pallas import tpu as pltpu

_IN_FEATURES = 4
_HIDDEN = 10
_SLAB_SUB = 16                    # sublanes per inner slab (16*128 = 2048 batch elems)
_QUANTUM = _SLAB_SUB * 128        # tile_b granularity (keeps slabs sublane-dense)
_MAX_TILE = 32768                 # lanes per grid step cap (512 KiB/buffer, fits all chips)


def _valuenet_kernel(x_ref, w1_ref, b1_ref, w2_ref, b2_ref, o_ref):
    """One batch tile of  relu(x @ W1 + b1) @ W2 + b2  in feature-major layout.

    x_ref : VMEM (4, TILE_SUB, 128) f32   (feature, sublane-block, lane) = batch-dense
    w1_ref: SMEM (4, 10)            f32
    b1_ref: SMEM (10,)              f32
    w2_ref: SMEM (10,)              f32
    b2_ref: SMEM (1,)               f32
    o_ref : VMEM (TILE_SUB, 128)    f32
    """
    tile_sub = o_ref.shape[0]
    n_slabs = tile_sub // _SLAB_SUB

    # Statically unrolled slab loop: ~12 live vregs per slab (4 feature slabs + h + out),
    # independent of the DMA tile size, so large tiles don't spill the 64-entry vreg file.
    for s in range(n_slabs):
        r0 = s * _SLAB_SUB
        x0 = x_ref[0, r0:r0 + _SLAB_SUB, :]        # (16, 128) each — fully dense vregs
        x1 = x_ref[1, r0:r0 + _SLAB_SUB, :]
        x2 = x_ref[2, r0:r0 + _SLAB_SUB, :]
        x3 = x_ref[3, r0:r0 + _SLAB_SUB, :]
        out = None
        for j in range(_HIDDEN):
            # Fold k=0 and b1[j] into the first op chain (no jnp.zeros broadcasts).
            h = w1_ref[0, j] * x0 + b1_ref[j]
            h = h + w1_ref[1, j] * x1
            h = h + w1_ref[2, j] * x2
            h = h + w1_ref[3, j] * x3
            h = jnp.maximum(h, 0.0)                # ReLU, fused in-register
            contrib = w2_ref[j] * h
            out = contrib if out is None else out + contrib
        o_ref[r0:r0 + _SLAB_SUB, :] = out + b2_ref[0]


def _round_up(x, m):
    return ((x + m - 1) // m) * m


def _choose_tiling(batch, tile_b):
    """Pick (tile_b, padded): tile_b a multiple of 2048, padded % tile_b == 0."""
    lanes_needed = _round_up(batch, _QUANTUM)
    n_q = lanes_needed // _QUANTUM
    if tile_b is None:
        steps = max(1, -(-n_q // (_MAX_TILE // _QUANTUM)))   # cap lanes/step at 32768
        if n_q >= 2:
            steps = max(steps, 2)        # v7x: keep both TensorCores busy ("parallel")
        tile_b = -(-n_q // steps) * _QUANTUM
    else:
        tile_b = max(_QUANTUM, _round_up(int(tile_b), _QUANTUM))
    padded = _round_up(batch, tile_b)
    return tile_b, padded


def value_net_forward(s, params, *, tile_b=None, min_pallas_batch=2048):
    """Pallas equivalent of ValueNet.forward.

    s: (B, 4) float32 (or (4,) for a single state).
    Returns (B,) predicted returns for 2-D input; shape (1,) for 1-D input
    (matching the PyTorch module, which only squeezes for 2-D inputs).
    """
    w1, b1, w2, b2 = params
    s = jnp.asarray(s, jnp.float32)
    if s.ndim == 1:
        s = s[None, :]
    batch = s.shape[0]

    if batch < min_pallas_batch:
        # Custom-call + DMA setup + the transpose pass cost several us; the fused XLA
        # expression wins for small batches (crossover ~2-4K rows).
        return (jnp.maximum(s @ w1 + b1[None, :], 0.0) @ w2[:, None] + b2)[:, 0]

    tile_b, padded = _choose_tiling(batch, tile_b)
    sub = padded // 128
    tile_sub = tile_b // 128

    # Feature-major, lane+sublane-dense layout: (padded, 4) -> (4, sub, 128).
    # Pad + transpose fuse into a single XLA copy; the reshape is free.
    x = jnp.pad(s, ((0, padded - batch), (0, 0))).T.reshape(_IN_FEATURES, sub, 128)

    out2d = pl.pallas_call(
        _valuenet_kernel,
        out_shape=jax.ShapeDtypeStruct((sub, 128), jnp.float32),
        grid=(padded // tile_b,),
        in_specs=[
            # Batch-tiled activations (VMEM, double-buffered by the pipeline).
            pl.BlockSpec((_IN_FEATURES, tile_sub, 128), lambda i: (0, i, 0)),
            # Tiny weights stay resident in SMEM (constant index_map -> fetched once;
            # scalar reads are cheap and broadcast onto the VPU).
            pl.BlockSpec((_IN_FEATURES, _HIDDEN), lambda i: (0, 0),
                         memory_space=pltpu.SMEM),
            pl.BlockSpec((_HIDDEN,), lambda i: (0,), memory_space=pltpu.SMEM),
            pl.BlockSpec((_HIDDEN,), lambda i: (0,), memory_space=pltpu.SMEM),
            pl.BlockSpec((1,), lambda i: (0,), memory_space=pltpu.SMEM),
        ],
        out_specs=pl.BlockSpec((tile_sub, 128), lambda i: (i, 0)),
        compiler_params=pltpu.CompilerParams(
            dimension_semantics=("parallel",)),     # shard grid steps across TCs (v7x)
    )(x, w1, b1, w2, b2)

    # (sub, 128) row-major == batch order after the transpose; slice off pad garbage.
    return out2d.reshape(padded)[:batch]


def value_net_reference(s, params):
    """Pure-JAX reference of the same math."""
    w1, b1, w2, b2 = params
    s = jnp.asarray(s, jnp.float32)
    if s.ndim == 1:
        s = s[None, :]
    return (jnp.maximum(s @ w1 + b1[None, :], 0.0) @ w2[:, None] + b2)[:, 0]


def init_params(key):
    """Deterministic init matching nn.Linear(4,10) / nn.Linear(10,1) shapes.

    PyTorch stores weights as (out, in); we store the transpose (in, out) plus flat
    biases, using torch's default uniform(-1/sqrt(fan_in), 1/sqrt(fan_in)).
    """
    k1, k2, k3, k4 = jax.random.split(key, 4)
    lim1 = 1.0 / jnp.sqrt(4.0)
    lim2 = 1.0 / jnp.sqrt(10.0)
    w1 = jax.random.uniform(k1, (4, 10), jnp.float32, -lim1, lim1)
    b1 = jax.random.uniform(k2, (10,), jnp.float32, -lim1, lim1)
    w2 = jax.random.uniform(k3, (10,), jnp.float32, -lim2, lim2)
    b2 = jax.random.uniform(k4, (1,), jnp.float32, -lim2, lim2)
    return (w1, b1, w2, b2)


if __name__ == "__main__":
    key = jax.random.PRNGKey(0)
    pkey, k1, k2, k3 = jax.random.split(key, 4)
    params = init_params(pkey)

    # 1) Forced Pallas path with an explicit small tile: B=3000 pads to 4096 lanes
    #    -> 2 grid steps of tile_b=2048 (exercises padding + multi-step grid).
    s = jax.random.normal(k1, (3000, 4), jnp.float32)
    out = jax.block_until_ready(
        value_net_forward(s, params, tile_b=2048, min_pallas_batch=1))
    ref = value_net_reference(s, params)
    assert out.shape == (3000,)
    assert jnp.allclose(out, ref, atol=1e-5, rtol=1e-5)

    # 2) Default auto-tiling path: B=4096 >= min_pallas_batch -> 2 steps of 2048.
    s_big = jax.random.normal(k2, (4096, 4), jnp.float32)
    out_big = jax.block_until_ready(value_net_forward(s_big, params))
    assert out_big.shape == (4096,)
    assert jnp.allclose(out_big, value_net_reference(s_big, params),
                        atol=1e-5, rtol=1e-5)

    # 3) Tiny batch takes the plain-XLA fallback (pallas_call overhead would dominate).
    s_small = jax.random.normal(k3, (3, 4), jnp.float32)
    out_small = jax.block_until_ready(value_net_forward(s_small, params))
    assert out_small.shape == (3,)
    assert jnp.allclose(out_small, value_net_reference(s_small, params),
                        atol=1e-5, rtol=1e-5)

    # 4) 1-D input path (matches PyTorch: no squeeze, result shape (1,)).
    out_1d = jax.block_until_ready(value_net_forward(s_small[0], params))
    assert out_1d.shape == (1,)

    print("KERNEL_OK")
</pallas_src>

<mosaic_0001>
module attributes {stable_mosaic.version = 11 : i64} {
  func.func @_valuenet_kernel(%arg0: i32, %arg1: memref<4x16x128xf32, #tpu.memory_space<vmem>>, %arg2: memref<4x10xf32, #tpu.memory_space<smem>>, %arg3: memref<10xf32, #tpu.memory_space<smem>>, %arg4: memref<10xf32, #tpu.memory_space<smem>>, %arg5: memref<1xf32, #tpu.memory_space<smem>>, %arg6: memref<16x128xf32, #tpu.memory_space<vmem>>) attributes {dimension_semantics = [#tpu.dimension_semantics<parallel>], iteration_bounds = array<i64: 2>, scalar_prefetch = 0 : i64, scratch_operands = 0 : i64, tpu.core_type = #tpu.core_type<tc>, window_params = [{transform_indices = @transform_0, window_bounds = array<i64: 4, 16, 128>}, {transform_indices = @transform_1, window_bounds = array<i64: 4, 10>}, {transform_indices = @transform_2, window_bounds = array<i64: 10>}, {transform_indices = @transform_3, window_bounds = array<i64: 10>}, {transform_indices = @transform_4, window_bounds = array<i64: 1>}, {transform_indices = @transform_5, window_bounds = array<i64: 16, 128>}]} {
    %c0 = arith.constant 0 : index
    %c0_0 = arith.constant 0 : index
    %c0_1 = arith.constant 0 : index
    %0 = vector.load %arg1[%c0, %c0_0, %c0_1] : memref<4x16x128xf32, #tpu.memory_space<vmem>>, vector<1x16x128xf32>
    %1 = vector.shape_cast %0 : vector<1x16x128xf32> to vector<16x128xf32>
    %c1 = arith.constant 1 : index
    %c0_2 = arith.constant 0 : index
    %c0_3 = arith.constant 0 : index
    %2 = vector.load %arg1[%c1, %c0_2, %c0_3] : memref<4x16x128xf32, #tpu.memory_space<vmem>>, vector<1x16x128xf32>
    %3 = vector.shape_cast %2 : vector<1x16x128xf32> to vector<16x128xf32>
    %c2 = arith.constant 2 : index
    %c0_4 = arith.constant 0 : index
    %c0_5 = arith.constant 0 : index
    %4 = vector.load %arg1[%c2, %c0_4, %c0_5] : memref<4x16x128xf32, #tpu.memory_space<vmem>>, vector<1x16x128xf32>
    %5 = vector.shape_cast %4 : vector<1x16x128xf32> to vector<16x128xf32>
    %c3 = arith.constant 3 : index
    %c0_6 = arith.constant 0 : index
    %c0_7 = arith.constant 0 : index
    %6 = vector.load %arg1[%c3, %c0_6, %c0_7] : memref<4x16x128xf32, #tpu.memory_space<vmem>>, vector<1x16x128xf32>
    %7 = vector.shape_cast %6 : vector<1x16x128xf32> to vector<16x128xf32>
    %c0_8 = arith.constant 0 : index
    %c0_9 = arith.constant 0 : index
    %8 = memref.load %arg2[%c0_8, %c0_9] : memref<4x10xf32, #tpu.memory_space<smem>>
    %9 = vector.broadcast %8 : f32 to vector<16x128xf32>
    %10 = arith.mulf %9, %1 : vector<16x128xf32>
    %c0_10 = arith.constant 0 : index
    %11 = memref.load %arg3[%c0_10] : memref<10xf32, #tpu.memory_space<smem>>
    %12 = vector.broadcast %11 : f32 to vector<16x128xf32>
    %13 = arith.addf %10, %12 : vector<16x128xf32>
    %c1_11 = arith.constant 1 : index
    %c0_12 = arith.constant 0 : index
    %14 = memref.load %arg2[%c1_11, %c0_12] : memref<4x10xf32, #tpu.memory_space<smem>>
    %15 = vector.broadcast %14 : f32 to vector<16x128xf32>
    %16 = arith.mulf %15, %3 : vector<16x128xf32>
    %17 = arith.addf %13, %16 : vector<16x128xf32>
    %c2_13 = arith.constant 2 : index
    %c0_14 = arith.constant 0 : index
    %18 = memref.load %arg2[%c2_13, %c0_14] : memref<4x10xf32, #tpu.memory_space<smem>>
    %19 = vector.broadcast %18 : f32 to vector<16x128xf32>
    %20 = arith.mulf %19, %5 : vector<16x128xf32>
    %21 = arith.addf %17, %20 : vector<16x128xf32>
    %c3_15 = arith.constant 3 : index
    %c0_16 = arith.constant 0 : index
    %22 = memref.load %arg2[%c3_15, %c0_16] : memref<4x10xf32, #tpu.memory_space<smem>>
    %23 = vector.broadcast %22 : f32 to vector<16x128xf32>
    %24 = arith.mulf %23, %7 : vector<16x128xf32>
    %25 = arith.addf %21, %24 : vector<16x128xf32>
    %cst = arith.constant 0.000000e+00 : f32
    %26 = vector.broadcast %cst : f32 to vector<16x128xf32>
    %27 = arith.maximumf %25, %26 : vector<16x128xf32>
    %c0_17 = arith.constant 0 : index
    %28 = memref.load %arg4[%c0_17] : memref<10xf32, #tpu.memory_space<smem>>
    %29 = vector.broadcast %28 : f32 to vector<16x128xf32>
    %30 = arith.mulf %29, %27 : vector<16x128xf32>
    %c0_18 = arith.constant 0 : index
    %c1_19 = arith.constant 1 : index
    %31 = memref.load %arg2[%c0_18, %c1_19] : memref<4x10xf32, #tpu.memory_space<smem>>
    %32 = vector.broadcast %31 : f32 to vector<16x128xf32>
    %33 = arith.mulf %32, %1 : vector<16x128xf32>
    %c1_20 = arith.constant 1 : index
    %34 = memref.load %arg3[%c1_20] : memref<10xf32, #tpu.memory_space<smem>>
    %35 = vector.broadcast %34 : f32 to vector<16x128xf32>
    %36 = arith.addf %33, %35 : vector<16x128xf32>
    %c1_21 = arith.constant 1 : index
    %c1_22 = arith.constant 1 : index
    %37 = memref.load %arg2[%c1_21, %c1_22] : memref<4x10xf32, #tpu.memory_space<smem>>
    %38 = vector.broadcast %37 : f32 to vector<16x128xf32>
    %39 = arith.mulf %38, %3 : vector<16x128xf32>
    %40 = arith.addf %36, %39 : vector<16x128xf32>
    %c2_23 = arith.constant 2 : index
    %c1_24 = arith.constant 1 : index
    %41 = memref.load %arg2[%c2_23, %c1_24] : memref<4x10xf32, #tpu.memory_space<smem>>
    %42 = vector.broadcast %41 : f32 to vector<16x128xf32>
    %43 = arith.mulf %42, %5 : vector<16x128xf32>
    %44 = arith.addf %40, %43 : vector<16x128xf32>
    %c3_25 = arith.constant 3 : index
    %c1_26 = arith.constant 1 : index
    %45 = memref.load %arg2[%c3_25, %c1_26] : memref<4x10xf32, #tpu.memory_space<smem>>
    %46 = vector.broadcast %45 : f32 to vector<16x128xf32>
    %47 = arith.mulf %46, %7 : vector<16x128xf32>
    %48 = arith.addf %44, %47 : vector<16x128xf32>
    %cst_27 = arith.constant 0.000000e+00 : f32
    %49 = vector.broadcast %cst_27 : f32 to vector<16x128xf32>
    %50 = arith.maximumf %48, %49 : vector<16x128xf32>
    %c1_28 = arith.constant 1 : index
    %51 = memref.load %arg4[%c1_28] : memref<10xf32, #tpu.memory_space<smem>>
    %52 = vector.broadcast %51 : f32 to vector<16x128xf32>
    %53 = arith.mulf %52, %50 : vector<16x128xf32>
    %54 = arith.addf %30, %53 : vector<16x128xf32>
    %c0_29 = arith.constant 0 : index
    %c2_30 = arith.constant 2 : index
    %55 = memref.load %arg2[%c0_29, %c2_30] : memref<4x10xf32, #tpu.memory_space<smem>>
    %56 = vector.broadcast %55 : f32 to vector<16x128xf32>
    %57 = arith.mulf %56, %1 : vector<16x128xf32>
    %c2_31 = arith.constant 2 : index
    %58 = memref.load %arg3[%c2_31] : memref<10xf32, #tpu.memory_space<smem>>
    %59 = vector.broadcast %58 : f32 to vector<16x128xf32>
    %60 = arith.addf %57, %59 : vector<16x128xf32>
    %c1_32 = arith.constant 1 : index
    %c2_33 = arith.constant 2 : index
    %61 = memref.load %arg2[%c1_32, %c2_33] : memref<4x10xf32, #tpu.memory_space<smem>>
    %62 = vector.broadcast %61 : f32 to vector<16x128xf32>
    %63 = arith.mulf %62, %3 : vector<16x128xf32>
    %64 = arith.addf %60, %63 : vector<16x128xf32>
    %c2_34 = arith.constant 2 : index
    %c2_35 = arith.constant 2 : index
    %65 = memref.load %arg2[%c2_34, %c2_35] : memref<4x10xf32, #tpu.memory_space<smem>>
    %66 = vector.broadcast %65 : f32 to vector<16x128xf32>
    %67 = arith.mulf %66, %5 : vector<16x128xf32>
    %68 = arith.addf %64, %67 : vector<16x128xf32>
    %c3_36 = arith.constant 3 : index
    %c2_37 = arith.constant 2 : index
    %69 = memref.load %arg2[%c3_36, %c2_37] : memref<4x10xf32, #tpu.memory_space<smem>>
    %70 = vector.broadcast %69 : f32 to vector<16x128xf32>
    %71 = arith.mulf %70, %7 : vector<16x128xf32>
    %72 = arith.addf %68, %71 : vector<16x128xf32>
    %cst_38 = arith.constant 0.000000e+00 : f32
    %73 = vector.broadcast %cst_38 : f32 to vector<16x128xf32>
    %74 = arith.maximumf %72, %73 : vector<16x128xf32>
    %c2_39 = arith.constant 2 : index
    %75 = memref.load %arg4[%c2_39] : memref<10xf32, #tpu.memory_space<smem>>
    %76 = vector.broadcast %75 : f32 to vector<16x128xf32>
    %77 = arith.mulf %76, %74 : vector<16x128xf32>
    %78 = arith.addf %54, %77 : vector<16x128xf32>
    %c0_40 = arith.constant 0 : index
    %c3_41 = arith.constant 3 : index
    %79 = memref.load %arg2[%c0_40, %c3_41] : memref<4x10xf32, #tpu.memory_space<smem>>
    %80 = vector.broadcast %79 : f32 to vector<16x128xf32>
    %81 = arith.mulf %80, %1 : vector<16x128xf32>
    %c3_42 = arith.constant 3 : index
    %82 = memref.load %arg3[%c3_42] : memref<10xf32, #tpu.memory_space<smem>>
    %83 = vector.broadcast %82 : f32 to vector<16x128xf32>
    %84 = arith.addf %81, %83 : vector<16x128xf32>
    %c1_43 = arith.constant 1 : index
    %c3_44 = arith.constant 3 : index
    %85 = memref.load %arg2[%c1_43, %c3_44] : memref<4x10xf32, #tpu.memory_space<smem>>
    %86 = vector.broadcast %85 : f32 to vector<16x128xf32>
    %87 = arith.mulf %86, %3 : vector<16x128xf32>
    %88 = arith.addf %84, %87 : vector<16x128xf32>
    %c2_45 = arith.constant 2 : index
    %c3_46 = arith.constant 3 : index
    %89 = memref.load %arg2[%c2_45, %c3_46] : memref<4x10xf32, #tpu.memory_space<smem>>
    %90 = vector.broadcast %89 : f32 to vector<16x128xf32>
    %91 = arith.mulf %90, %5 : vector<16x128xf32>
    %92 = arith.addf %88, %91 : vector<16x128xf32>
    %c3_47 = arith.constant 3 : index
    %c3_48 = arith.constant 3 : index
    %93 = memref.load %arg2[%c3_47, %c3_48] : memref<4x10xf32, #tpu.memory_space<smem>>
    %94 = vector.broadcast %93 : f32 to vector<16x128xf32>
    %95 = arith.mulf %94, %7 : vector<16x128xf32>
    %96 = arith.addf %92, %95 : vector<16x128xf32>
    %cst_49 = arith.constant 0.000000e+00 : f32
    %97 = vector.broadcast %cst_49 : f32 to vector<16x128xf32>
    %98 = arith.maximumf %96, %97 : vector<16x128xf32>
    %c3_50 = arith.constant 3 : index
    %99 = memref.load %arg4[%c3_50] : memref<10xf32, #tpu.memory_space<smem>>
    %100 = vector.broadcast %99 : f32 to vector<16x128xf32>
    %101 = arith.mulf %100, %98 : vector<16x128xf32>
    %102 = arith.addf %78, %101 : vector<16x128xf32>
    %c0_51 = arith.constant 0 : index
    %c4 = arith.constant 4 : index
    %103 = memref.load %arg2[%c0_51, %c4] : memref<4x10xf32, #tpu.memory_space<smem>>
    %104 = vector.broadcast %103 : f32 to vector<16x128xf32>
    %105 = arith.mulf %104, %1 : vector<16x128xf32>
    %c4_52 = arith.constant 4 : index
    %106 = memref.load %arg3[%c4_52] : memref<10xf32, #tpu.memory_space<smem>>
    %107 = vector.broadcast %106 : f32 to vector<16x128xf32>
    %108 = arith.addf %105, %107 : vector<16x128xf32>
    %c1_53 = arith.constant 1 : index
    %c4_54 = arith.constant 4 : index
    %109 = memref.load %arg2[%c1_53, %c4_54] : memref<4x10xf32, #tpu.memory_space<smem>>
    %110 = vector.broadcast %109 : f32 to vector<16x128xf32>
    %111 = arith.mulf %110, %3 : vector<16x128xf32>
    %112 = arith.addf %108, %111 : vector<16x128xf32>
    %c2_55 = arith.constant 2 : index
    %c4_56 = arith.constant 4 : index
    %113 = memref.load %arg2[%c2_55, %c4_56] : memref<4x10xf32, #tpu.memory_space<smem>>
    %114 = vector.broadcast %113 : f32 to vector<16x128xf32>
    %115 = arith.mulf %114, %5 : vector<16x128xf32>
    %116 = arith.addf %112, %115 : vector<16x128xf32>
    %c3_57 = arith.constant 3 : index
    %c4_58 = arith.constant 4 : index
    %117 = memref.load %arg2[%c3_57, %c4_58] : memref<4x10xf32, #tpu.memory_space<smem>>
    %118 = vector.broadcast %117 : f32 to vector<16x128xf32>
    %119 = arith.mulf %118, %7 : vector<16x128xf32>
    %120 = arith.addf %116, %119 : vector<16x128xf32>
    %cst_59 = arith.constant 0.000000e+00 : f32
    %121 = vector.broadcast %cst_59 : f32 to vector<16x128xf32>
    %122 = arith.maximumf %120, %121 : vector<16x128xf32>
    %c4_60 = arith.constant 4 : index
    %123 = memref.load %arg4[%c4_60] : memref<10xf32, #tpu.memory_space<smem>>
    %124 = vector.broadcast %123 : f32 to vector<16x128xf32>
    %125 = arith.mulf %124, %122 : vector<16x128xf32>
    %126 = arith.addf %102, %125 : vector<16x128xf32>
    %c0_61 = arith.constant 0 : index
    %c5 = arith.constant 5 : index
    %127 = memref.load %arg2[%c0_61, %c5] : memref<4x10xf32, #tpu.memory_space<smem>>
    %128 = vector.broadcast %127 : f32 to vector<16x128xf32>
    %129 = arith.mulf %128, %1 : vector<16x128xf32>
    %c5_62 = arith.constant 5 : index
    %130 = memref.load %arg3[%c5_62] : memref<10xf32, #tpu.memory_space<smem>>
    %131 = vector.broadcast %130 : f32 to vector<16x128xf32>
    %132 = arith.addf %129, %131 : vector<16x128xf32>
    %c1_63 = arith.constant 1 : index
    %c5_64 = arith.constant 5 : index
    %133 = memref.load %arg2[%c1_63, %c5_64] : memref<4x10xf32, #tpu.memory_space<smem>>
    %134 = vector.broadcast %133 : f32 to vector<16x128xf32>
    %135 = arith.mulf %134, %3 : vector<16x128xf32>
    %136 = arith.addf %132, %135 : vector<16x128xf32>
    %c2_65 = arith.constant 2 : index
    %c5_66 = arith.constant 5 : index
    %137 = memref.load %arg2[%c2_65, %c5_66] : memref<4x10xf32, #tpu.memory_space<smem>>
    %138 = vector.broadcast %137 : f32 to vector<16x128xf32>
    %139 = arith.mulf %138, %5 : vector<16x128xf32>
    %140 = arith.addf %136, %139 : vector<16x128xf32>
    %c3_67 = arith.constant 3 : index
    %c5_68 = arith.constant 5 : index
    %141 = memref.load %arg2[%c3_67, %c5_68] : memref<4x10xf32, #tpu.memory_space<smem>>
    %142 = vector.broadcast %141 : f32 to vector<16x128xf32>
    %143 = arith.mulf %142, %7 : vector<16x128xf32>
    %144 = arith.addf %140, %143 : vector<16x128xf32>
    %cst_69 = arith.constant 0.000000e+00 : f32
    %145 = vector.broadcast %cst_69 : f32 to vector<16x128xf32>
    %146 = arith.maximumf %144, %145 : vector<16x128xf32>
    %c5_70 = arith.constant 5 : index
    %147 = memref.load %arg4[%c5_70] : memref<10xf32, #tpu.memory_space<smem>>
    %148 = vector.broadcast %147 : f32 to vector<16x128xf32>
    %149 = arith.mulf %148, %146 : vector<16x128xf32>
    %150 = arith.addf %126, %149 : vector<16x128xf32>
    %c0_71 = arith.constant 0 : index
    %c6 = arith.constant 6 : index
    %151 = memref.load %arg2[%c0_71, %c6] : memref<4x10xf32, #tpu.memory_space<smem>>
    %152 = vector.broadcast %151 : f32 to vector<16x128xf32>
    %153 = arith.mulf %152, %1 : vector<16x128xf32>
    %c6_72 = arith.constant 6 : index
    %154 = memref.load %arg3[%c6_72] : memref<10xf32, #tpu.memory_space<smem>>
    %155 = vector.broadcast %154 : f32 to vector<16x128xf32>
    %156 = arith.addf %153, %155 : vector<16x128xf32>
    %c1_73 = arith.constant 1 : index
    %c6_74 = arith.constant 6 : index
    %157 = memref.load %arg2[%c1_73, %c6_74] : memref<4x10xf32, #tpu.memory_space<smem>>
    %158 = vector.broadcast %157 : f32 to vector<16x128xf32>
    %159 = arith.mulf %158, %3 : vector<16x128xf32>
    %160 = arith.addf %156, %159 : vector<16x128xf32>
    %c2_75 = arith.constant 2 : index
    %c6_76 = arith.constant 6 : index
    %161 = memref.load %arg2[%c2_75, %c6_76] : memref<4x10xf32, #tpu.memory_space<smem>>
    %162 = vector.broadcast %161 : f32 to vector<16x128xf32>
    %163 = arith.mulf %162, %5 : vector<16x128xf32>
    %164 = arith.addf %160, %163 : vector<16x128xf32>
    %c3_77 = arith.constant 3 : index
    %c6_78 = arith.constant 6 : index
    %165 = memref.load %arg2[%c3_77, %c6_78] : memref<4x10xf32, #tpu.memory_space<smem>>
    %166 = vector.broadcast %165 : f32 to vector<16x128xf32>
    %167 = arith.mulf %166, %7 : vector<16x128xf32>
    %168 = arith.addf %164, %167 : vector<16x128xf32>
    %cst_79 = arith.constant 0.000000e+00 : f32
    %169 = vector.broadcast %cst_79 : f32 to vector<16x128xf32>
    %170 = arith.maximumf %168, %169 : vector<16x128xf32>
    %c6_80 = arith.constant 6 : index
    %171 = memref.load %arg4[%c6_80] : memref<10xf32, #tpu.memory_space<smem>>
    %172 = vector.broadcast %171 : f32 to vector<16x128xf32>
    %173 = arith.mulf %172, %170 : vector<16x128xf32>
    %174 = arith.addf %150, %173 : vector<16x128xf32>
    %c0_81 = arith.constant 0 : index
    %c7 = arith.constant 7 : index
    %175 = memref.load %arg2[%c0_81, %c7] : memref<4x10xf32, #tpu.memory_space<smem>>
    %176 = vector.broadcast %175 : f32 to vector<16x128xf32>
    %177 = arith.mulf %176, %1 : vector<16x128xf32>
    %c7_82 = arith.constant 7 : index
    %178 = memref.load %arg3[%c7_82] : memref<10xf32, #tpu.memory_space<smem>>
    %179 = vector.broadcast %178 : f32 to vector<16x128xf32>
    %180 = arith.addf %177, %179 : vector<16x128xf32>
    %c1_83 = arith.constant 1 : index
    %c7_84 = arith.constant 7 : index
    %181 = memref.load %arg2[%c1_83, %c7_84] : memref<4x10xf32, #tpu.memory_space<smem>>
    %182 = vector.broadcast %181 : f32 to vector<16x128xf32>
    %183 = arith.mulf %182, %3 : vector<16x128xf32>
    %184 = arith.addf %180, %183 : vector<16x128xf32>
    %c2_85 = arith.constant 2 : index
    %c7_86 = arith.constant 7 : index
    %185 = memref.load %arg2[%c2_85, %c7_86] : memref<4x10xf32, #tpu.memory_space<smem>>
    %186 = vector.broadcast %185 : f32 to vector<16x128xf32>
    %187 = arith.mulf %186, %5 : vector<16x128xf32>
    %188 = arith.addf %184, %187 : vector<16x128xf32>
    %c3_87 = arith.constant 3 : index
    %c7_88 = arith.constant 7 : index
    %189 = memref.load %arg2[%c3_87, %c7_88] : memref<4x10xf32, #tpu.memory_space<smem>>
    %190 = vector.broadcast %189 : f32 to vector<16x128xf32>
    %191 = arith.mulf %190, %7 : vector<16x128xf32>
    %192 = arith.addf %188, %191 : vector<16x128xf32>
    %cst_89 = arith.constant 0.000000e+00 : f32
    %193 = vector.broadcast %cst_89 : f32 to vector<16x128xf32>
    %194 = arith.maximumf %192, %193 : vector<16x128xf32>
    %c7_90 = arith.constant 7 : index
    %195 = memref.load %arg4[%c7_90] : memref<10xf32, #tpu.memory_space<smem>>
    %196 = vector.broadcast %195 : f32 to vector<16x128xf32>
    %197 = arith.mulf %196, %194 : vector<16x128xf32>
    %198 = arith.addf %174, %197 : vector<16x128xf32>
    %c0_91 = arith.constant 0 : index
    %c8 = arith.constant 8 : index
    %199 = memref.load %arg2[%c0_91, %c8] : memref<4x10xf32, #tpu.memory_space<smem>>
    %200 = vector.broadcast %199 : f32 to vector<16x128xf32>
    %201 = arith.mulf %200, %1 : vector<16x128xf32>
    %c8_92 = arith.constant 8 : index
    %202 = memref.load %arg3[%c8_92] : memref<10xf32, #tpu.memory_space<smem>>
    %203 = vector.broadcast %202 : f32 to vector<16x128xf32>
    %204 = arith.addf %201, %203 : vector<16x128xf32>
    %c1_93 = arith.constant 1 : index
    %c8_94 = arith.constant 8 : index
    %205 = memref.load %arg2[%c1_93, %c8_94] : memref<4x10xf32, #tpu.memory_space<smem>>
    %206 = vector.broadcast %205 : f32 to vector<16x128xf32>
    %207 = arith.mulf %206, %3 : vector<16x128xf32>
    %208 = arith.addf %204, %207 : vector<16x128xf32>
    %c2_95 = arith.constant 2 : index
    %c8_96 = arith.constant 8 : index
    %209 = memref.load %arg2[%c2_95, %c8_96] : memref<4x10xf32, #tpu.memory_space<smem>>
    %210 = vector.broadcast %209 : f32 to vector<16x128xf32>
    %211 = arith.mulf %210, %5 : vector<16x128xf32>
    %212 = arith.addf %208, %211 : vector<16x128xf32>
    %c3_97 = arith.constant 3 : index
    %c8_98 = arith.constant 8 : index
    %213 = memref.load %arg2[%c3_97, %c8_98] : memref<4x10xf32, #tpu.memory_space<smem>>
    %214 = vector.broadcast %213 : f32 to vector<16x128xf32>
    %215 = arith.mulf %214, %7 : vector<16x128xf32>
    %216 = arith.addf %212, %215 : vector<16x128xf32>
    %cst_99 = arith.constant 0.000000e+00 : f32
    %217 = vector.broadcast %cst_99 : f32 to vector<16x128xf32>
    %218 = arith.maximumf %216, %217 : vector<16x128xf32>
    %c8_100 = arith.constant 8 : index
    %219 = memref.load %arg4[%c8_100] : memref<10xf32, #tpu.memory_space<smem>>
    %220 = vector.broadcast %219 : f32 to vector<16x128xf32>
    %221 = arith.mulf %220, %218 : vector<16x128xf32>
    %222 = arith.addf %198, %221 : vector<16x128xf32>
    %c0_101 = arith.constant 0 : index
    %c9 = arith.constant 9 : index
    %223 = memref.load %arg2[%c0_101, %c9] : memref<4x10xf32, #tpu.memory_space<smem>>
    %224 = vector.broadcast %223 : f32 to vector<16x128xf32>
    %225 = arith.mulf %224, %1 : vector<16x128xf32>
    %c9_102 = arith.constant 9 : index
    %226 = memref.load %arg3[%c9_102] : memref<10xf32, #tpu.memory_space<smem>>
    %227 = vector.broadcast %226 : f32 to vector<16x128xf32>
    %228 = arith.addf %225, %227 : vector<16x128xf32>
    %c1_103 = arith.constant 1 : index
    %c9_104 = arith.constant 9 : index
    %229 = memref.load %arg2[%c1_103, %c9_104] : memref<4x10xf32, #tpu.memory_space<smem>>
    %230 = vector.broadcast %229 : f32 to vector<16x128xf32>
    %231 = arith.mulf %230, %3 : vector<16x128xf32>
    %232 = arith.addf %228, %231 : vector<16x128xf32>
    %c2_105 = arith.constant 2 : index
    %c9_106 = arith.constant 9 : index
    %233 = memref.load %arg2[%c2_105, %c9_106] : memref<4x10xf32, #tpu.memory_space<smem>>
    %234 = vector.broadcast %233 : f32 to vector<16x128xf32>
    %235 = arith.mulf %234, %5 : vector<16x128xf32>
    %236 = arith.addf %232, %235 : vector<16x128xf32>
    %c3_107 = arith.constant 3 : index
    %c9_108 = arith.constant 9 : index
    %237 = memref.load %arg2[%c3_107, %c9_108] : memref<4x10xf32, #tpu.memory_space<smem>>
    %238 = vector.broadcast %237 : f32 to vector<16x128xf32>
    %239 = arith.mulf %238, %7 : vector<16x128xf32>
    %240 = arith.addf %236, %239 : vector<16x128xf32>
    %cst_109 = arith.constant 0.000000e+00 : f32
    %241 = vector.broadcast %cst_109 : f32 to vector<16x128xf32>
    %242 = arith.maximumf %240, %241 : vector<16x128xf32>
    %c9_110 = arith.constant 9 : index
    %243 = memref.load %arg4[%c9_110] : memref<10xf32, #tpu.memory_space<smem>>
    %244 = vector.broadcast %243 : f32 to vector<16x128xf32>
    %245 = arith.mulf %244, %242 : vector<16x128xf32>
    %246 = arith.addf %222, %245 : vector<16x128xf32>
    %c0_111 = arith.constant 0 : index
    %247 = memref.load %arg5[%c0_111] : memref<1xf32, #tpu.memory_space<smem>>
    %248 = vector.broadcast %247 : f32 to vector<16x128xf32>
    %249 = arith.addf %246, %248 : vector<16x128xf32>
    %c0_112 = arith.constant 0 : index
    %c0_113 = arith.constant 0 : index
    %250 = vector.load %arg6[%c0_112, %c0_113] : memref<16x128xf32, #tpu.memory_space<vmem>>, vector<16x128xf32>
    tpu.vector_store %arg6[%c0_112, %c0_113], %249 {strides = array<i32>} : memref<16x128xf32, #tpu.memory_space<vmem>>, vector<16x128xf32>,
    return
  }
  func.func @transform_0(%arg0: i32) -> (i32, i32, i32) {
    %c0_i32 = arith.constant 0 : i32
    %c0_i32_0 = arith.constant 0 : i32
    %c0_i32_1 = arith.constant 0 : i32
    return %c0_i32, %arg0, %c0_i32_0 : i32, i32, i32
  }
  func.func @transform_1(%arg0: i32) -> (i32, i32) {
    %c0_i32 = arith.constant 0 : i32
    %c0_i32_0 = arith.constant 0 : i32
    %c0_i32_1 = arith.constant 0 : i32
    return %c0_i32, %c0_i32_0 : i32, i32
  }
  func.func @transform_2(%arg0: i32) -> i32 {
    %c0_i32 = arith.constant 0 : i32
    %c0_i32_0 = arith.constant 0 : i32
    return %c0_i32 : i32
  }
  func.func @transform_3(%arg0: i32) -> i32 {
    %c0_i32 = arith.constant 0 : i32
    %c0_i32_0 = arith.constant 0 : i32
    return %c0_i32 : i32
  }
  func.func @transform_4(%arg0: i32) -> i32 {
    %c0_i32 = arith.constant 0 : i32
    %c0_i32_0 = arith.constant 0 : i32
    return %c0_i32 : i32
  }
  func.func @transform_5(%arg0: i32) -> (i32, i32) {
    %c0_i32 = arith.constant 0 : i32
    %c0_i32_0 = arith.constant 0 : i32
    return %arg0, %c0_i32 : i32, i32
  }
}

</mosaic_0001>

<bundles_post_ra>
// kernel: tpu_custom_call.1
= control target key start
LH: loop header
LB: loop body
LE: loop exit
PB: predicated region body
PF: predicated region fallthrough
CT: control target
= control target key end

     0   :  { %s1583_s0 = inlined_call_operand.hbm [shape: f32[4,32,128], index: 0, kind: input, shape index: {}]   ;;  %s1584_s1 = inlined_call_operand.vmem [shape: f32[4,10], index: 1, kind: input, shape index: {}]   ;;  %s1585_s2 = inlined_call_operand.vmem [shape: f32[10], index: 2, kind: input, shape index: {}]   ;;  %s1586_s3 = inlined_call_operand.vmem [shape: f32[10], index: 3, kind: input, shape index: {}]   ;;  %s1587_s4 = inlined_call_operand.<no memory space> [shape: f32[1], index: 4, kind: input, shape index: {}]   ;;  %s1588_s5 = inlined_call_operand.hbm [shape: f32[32,128], index: 5, kind: output, shape index: {}]  }
   0x1   :  { %10 = sst [smem:[#allocation2]] %s1587_s4 }
   0x2   :  { %11 = vsyncpa [#allocation4], 0 }
   0x3   :  { %13 = vsyncpa [#allocation4 + $0x1], 0 }
   0x4   :  { %14 = vsyncpa [#allocation6], 0 }
   0x5   :  { %15 = vsyncpa [#allocation9], 0 }
   0x6   :  { %16 = vsyncpa [#allocation5], 0 }
   0x7   :  { %18 = vsyncpa [#allocation5 + $0x1], 0  ;;  %s1123_s20 = smov 0   ;;  %s1125_s21 = smov 0  }
   0x8   :  { %s1127_s22 = smov 0   ;;  %s1129_s23 = smov 0  }
   0x9 LB: > { %s1144_s4 = sadd.s32 4294967295, %s1076_s23   ;;  %s783_s24 = sadd.s32 4294967294, %s1076_s23   ;;  %s1076_s23 = sphi %s1129_s23, %s1612_s23   ;;  %s1072_s22 = sphi %s1127_s22, %s1611_s22   ;;  %s1068_s21 = sphi %s1125_s21, %s1610_s21   ;;  %s1064_s20 = sphi %s1123_s20, %s1609_s20  }
   0xa   : > { %s1148_s25 = sadd.s32 1, %s1076_s23   ;;  %s31_s26 = sadd.s32 1, %s1072_s22 }
   0xb   : > { %s28_s27 = ssub.s32 %s1076_s23, %s1148_s25  ;;  %p38_p0 = scmp.ne.s32.totalorder %s1072_s22, %s1068_s21 }
   0xc   : > { %p29_p1 = scmp.eq.s32.totalorder %s28_s27, 0  ;;  %p39_p2 = scmp.eq.s32.totalorder %s1076_s23, 0 }
   0xd   : > { %p44_p3 = scmp.ne.s32.totalorder %s1068_s21, %s1064_s20  ;;  %p1589_p4 = scmp.eq.s32.totalorder %s1144_s4, 0 }
   0xe   : > { %s1160_s28 = scalar_select %p29_p1, %s1072_s22, %s31_s26  }
   0xf   : > { %p1162_p5 = por %p39_p2, %p38_p0  ;;  %p1168_p6 = por %p1589_p4, %p44_p3 }
  0x10   : > { %p152_p7 = scmp.eq.s32.totalorder %s1144_s4, 1  ;;  %p158_p8 = scmp.eq.s32.totalorder %s783_s24, 1 }
  0x11   : > { %s1594_s29 = scalar_select %p1162_p5, 1, 0 }
  0x12   : > { %s1595_s30 = scalar_select %p1168_p6, 1, 0 }
  0x13   : > { %p784_p9 = scmp.ge.s32.totalorder %s1076_s23, 1  ;;  %p165_p10 = scmp.lt.s32.totalorder %s1076_s23, 3 }
  0x14   : > { %p1175_p11 = por %p152_p7, %p38_p0  ;;  %p1179_p12 = por %p158_p8, %p44_p3 }
  0x15   : > { %p1183_p13 = pnand %p784_p9, %p165_p10  ;;  %s189_s11 = sshll.u32 %s1585_s2, 4  ;;  %s190_s11 = int_to_ptr.vmem [resolvable:$true] %s189_s11 }
  0x16   : > { %s1596_s6 = scalar_select %p1175_p11, 1, 0 }
  0x17   : > { %s1597_s7 = scalar_select %p1179_p12, 1, 0 }
  0x18   : > { %s1598_s8 = scalar_select %p1183_p13, 1, 0 }
  0x19   : > { %p893_p1 = pneg %p1183_p13  ;;  %s178_s14 = sshll.u32 %s1584_s1, 4  ;;  %s179_s14 = int_to_ptr.vmem [resolvable:$true] %s178_s14 }
  0x1a   : > { %s200_s18 = sshll.u32 %s1586_s3, 4  ;;  %s957_s19 = scalar_lea.vmem %s190_s11, 16  ;;  %s1204_s18 = int_to_ptr.vmem [resolvable:$true] %s200_s18 }
  0x1b   : > { %p1197_p0 = pnand %p893_p1, %p1589_p4  ;;  %p958_p2 = scmp.ne.s32.totalorder %s190_s11, %s957_s19 }
  0x1c   : > { %p965_p9 = scmp.lt.s32.totalorder %s190_s11, %s190_s11  ;;  %p966_p10 = scmp.lt.s32.totalorder %s957_s19, %s957_s19 }
  0x1d   : > { %p959_p3 = pneg %p1197_p0 }
  0x1e   : > { %p967_p1 = por %p966_p10, %p965_p9 }
  0x1f   : > { %p960_p7 = pnand %p959_p3, %p958_p2 }
  0x21   : > { %p961_p8 = pneg %p960_p7 }
  0x23   : > { %p968_p4 = pnand %p967_p1, %p961_p8 }
  0x25   : > { %971 = shalt.err (!%p968_p4)
}
  0x26   : > { %s1078_s24 = smov [#allocation8]   ;;  %s972_s26 = scalar_lea.vmem %s179_s14, 64 }
  0x27   : > { %899 = dma.vmem_to_smem (!%p1197_p0), %s190_s11, 16, %s1078_s24, [#allocation9]  }
  0x28   : > { %p973_p12 = scmp.ne.s32.totalorder %s179_s14, %s972_s26  ;;  %p980_p13 = scmp.lt.s32.totalorder %s179_s14, %s179_s14 }
  0x29   : > { %p981_p5 = scmp.lt.s32.totalorder %s972_s26, %s972_s26 }
  0x2a   : > { %p975_p11 = pnand %p973_p12, %p959_p3 }
  0x2b   : > { %p982_p2 = por %p981_p5, %p980_p13 }
  0x2c   : > { %p976_p6 = pneg %p975_p11 }
  0x2e   : > { %p983_p7 = pnand %p982_p2, %p976_p6 }
  0x30   : > { %986 = shalt.err (!%p983_p7)
}
  0x31   : > { %s1079_s27 = smov [#allocation7]   ;;  %s987_s9 = scalar_lea.vmem %s1204_s18, 16 }
  0x32   : > { %896 = dma.vmem_to_smem (!%p1197_p0), %s179_s14, 64, %s1079_s27, [#allocation6]  }
  0x33   : > { %p988_p4 = scmp.ne.s32.totalorder %s1204_s18, %s987_s9  ;;  %p995_p11 = scmp.lt.s32.totalorder %s1204_s18, %s1204_s18 }
  0x34   : > { %p996_p9 = scmp.lt.s32.totalorder %s987_s9, %s987_s9 }
  0x35   : > { %p990_p8 = pnand %p988_p4, %p959_p3 }
  0x36   : > { %p997_p5 = por %p996_p9, %p995_p11 }
  0x37   : > { %p991_p12 = pneg %p990_p8 }
  0x39   : > { %p998_p6 = pnand %p997_p5, %p991_p12 }
  0x3b   : > { %1001 = shalt.err (!%p998_p6)
}
  0x3c   : > { %s1080_s10 = smov [#allocation10]   ;;  %p788_p13 = scmp.ge.s32.totalorder %s1076_s23, 2 }
  0x3d   : > { %902 = dma.vmem_to_smem (!%p1197_p0), %s1204_s18, 16, %s1080_s10, [#allocation9]  }
  0x3e   : > { %210 = sbr.rel (%p788_p13) target bundleno = 84 (0x54), region = 32 }
  0x45   : > { %s214_s11 = sand.u32 1, %s1072_s22   ;;  %s868_s12 = sshll.u32 %s1076_s23, 8 }
  0x46   : > { %s789_s13 = sshll.u32 %s214_s11, 6  ;;  %s224_s16 = scalar_lea.hbm %s1583_s0, %s868_s12 }
  0x47   : > { %p1600_p0 = scmp.ne.s32.totalorder %s1594_s29, 0  ;;  %s218_s18 = scalar_lea.vmem [#allocation3], %s789_s13 }
  0x48   : > { %s237_s19 = sshll.u32 %s218_s18, 4  ;;  %s1081_s26 = smov 512   ;;  %s238_s19 = int_to_ptr.vmem [resolvable:$true] %s237_s19 }
  0x49   : > { %s876_s17 = scalar_select %p1600_p0, [#allocation0], [#allocation14] }
  0x4a   : > { %877 = sst [smem:[#allocation13]] (%p1600_p0), %s1081_s26  ;;  %s1082_s27 = smov 256  }
  0x4b   : > { %s229_s24 = sld [smem:[%s876_s17]]   ;;  %s1083_s9 = smov 2  }
  0x4c   : > { %878 = sst [smem:[#allocation13 + $0x1]] (%p1600_p0), %s1082_s27  ;;  %s1084_s10 = smov 128  }
  0x4d   : > { %879 = sst [smem:[#allocation13 + $0x2]] (%p1600_p0), %s1083_s9  ;;  %s1085_s13 = smov 8  }
  0x4e   : > { %880 = sst [smem:[#allocation13 + $0x3]] (%p1600_p0), %s1084_s10  ;;  %s215_s15 = scalar_lea.sflag [#allocation4], %s214_s11 }
  0x4f   : > { %881 = sst [smem:[#allocation13 + $0x4]] (%p1600_p0), %s1084_s10  ;;  %s1086_s17 = smov [#allocation12]  }
  0x50   : > { %882 = sst [smem:[#allocation13 + $0x5]] (%p1600_p0), %s1085_s13 }
  0x51   : > { %s792_s12 = sshll.u32 %s229_s24, 26 }
  0x52   : > { %s793_s14 = sadd.s32 134217728, %s792_s12 }
  0x53   : > { %883 = dma.general (%p1600_p0), %s224_s16, 1024, %s238_s19, %s215_s15, %s1086_s17, [#allocation13], %s793_s14, 0  }
  0x54 PF: > { %p1601_p3 = scmp.ne.s32.totalorder %s1598_s8, 0 }
  0x55   : > { %s1255_s18 = sand.u32 (!%p1601_p3), 1, %s1068_s21   ;;  %p1602_p10 = scmp.ne.s32.totalorder (!%p1601_p3), %s1595_s30, 0 }
  0x56   : > { %262 = sbr.rel (%p1601_p3) target bundleno = 203 (0xcb), region = 40  ;;  %s795_s26 = sshll.u32 (!%p1601_p3), %s1255_s18, 6 }
  0x57   : > { %s265_s24 = scalar_lea.sflag (!%p1601_p3), [#allocation4], %s1255_s18  ;;  %s268_s27 = scalar_lea.vmem (!%p1601_p3), [#allocation3], %s795_s26 }
  0x5d   : > { %1047 = dma.done.wait (%p1602_p10), %s265_s24, 1024  }
  0x5e   : > { %1049 = vsyncadd (%p1602_p10), %s265_s24, 4294966272  ;;  %p1603_p1 = scmp.eq.s32.totalorder %s1144_s4, 0 }
  0x60   : > { %1051 = dma.done.wait (%p1603_p1), [#allocation6], 64   ;;  %p1604_p2 = pmov %p1603_p1 }
  0x61   : > { %p1605_p7 = pmov %p1603_p1 }
  0x62   : > { %1053 = vsyncadd (%p1604_p2), [#allocation6], 4294967232 }
  0x63   : > { %1055 = dma.done.wait (%p1605_p7), [#allocation9], 32   ;;  %p1606_p4 = pmov %p1603_p1 }
  0x65   : > { %1057 = vsyncadd (%p1606_p4), [#allocation9], 4294967264 }
  0x66   : > { %285 = sfence }
  0x67   : > { %s321_s29 = sld [smem:[#allocation7]]  ;;  %v1273_v0 = vld [vmem:[%s268_s27] sm:$0xff]  ;;  %v1275_v1 = vld [vmem:[%s268_s27 + $0x8] sm:$0xff]  ;;  %s1277_s30 = sld [smem:[#allocation7 + $0x1]]  ;;  %v1285_v2 = vld [vmem:[%s268_s27 + $0x10] sm:$0xff] }
  0x68   : > { %s325_s8 = sld [smem:[#allocation8]]  ;;  %s1279_s9 = sld [smem:[#allocation8 + $0x1]]  ;;  %v1287_v3 = vld [vmem:[%s268_s27 + $0x18] sm:$0xff]  ;;  %v1289_v5 = vld [vmem:[%s268_s27 + $0x20] sm:$0xff]  ;;  %v1291_v6 = vld [vmem:[%s268_s27 + $0x28] sm:$0xff] }
  0x69   : > { %s806_s11 = sld [smem:[#allocation7 + $0x80]]  ;;  %s1281_s10 = sld [smem:[#allocation7 + $0x81]]  ;;  %v1297_v10 = vld [vmem:[%s268_s27 + $0x30] sm:$0xff]  ;;  %v1299_v11 = vld [vmem:[%s268_s27 + $0x38] sm:$0xff] }
  0x6a   : > { %s807_s16 = sld [smem:[#allocation7 + $0x100]]  ;;  %s1283_s12 = sld [smem:[#allocation7 + $0x101]] }
  0x6b   : > { %s1271_s19 = sld [smem:[#allocation7 + $0x180]]  ;;  %s1301_s14 = sld [smem:[#allocation7 + $0x181]] }
  0x6c   : > { %s1295_s13 = sld [smem:[#allocation10]]  ;;  %s1303_s15 = sld [smem:[#allocation7 + $0x2]] }
  0x6d   : > { %v322_v4 = vstv %s321_s29  ;;  %s1307_s17 = sld [smem:[#allocation8 + $0x2]]  ;;  %s1314_s26 = sld [smem:[#allocation10 + $0x1]]  ;;  %v354_v25 = vstv %s1277_s30 }
  0x6e   : > { %v323_v7 = vmul.f32 %v322_v4, %v1273_v0  ;;  %v324_v8 = vmul.f32 %v322_v4, %v1275_v1  ;;  %v326_v9 = vstv %s325_s8  ;;  %v358_v26 = vstv %s1279_s9  ;;  %s1320_s24 = sld [smem:[#allocation7 + $0x82]]  ;;  %s1335_s8 = sld [smem:[#allocation7 + $0x3]] }
  0x6f   : > { %v330_v12 = vstv %s806_s11  ;;  %v362_v27 = vstv %s1281_s10  ;;  %s1322_s27 = sld [smem:[#allocation7 + $0x102]]  ;;  %v355_v31 = vmul.f32 %v354_v25, %v1273_v0  ;;  %v356_v32 = vmul.f32 %v354_v25, %v1275_v1  ;;  %s1338_s11 = sld [smem:[#allocation8 + $0x3]] }
  0x70   : > { %v336_v13 = vstv %s807_s16  ;;  %v327_v14 = vadd.f32 %v326_v9, %v323_v7  ;;  %v328_v15 = vadd.f32 %v326_v9, %v324_v8  ;;  %v331_v16 = vmul.f32 %v1285_v2, %v330_v12  ;;  %s1330_s29 = sld [smem:[#allocation7 + $0x182]]  ;;  %s1344_s16 = sld [smem:[#allocation7 + $0x83]] }
  0x71   : > { %v332_v17 = vmul.f32 %v1287_v3, %v330_v12  ;;  %v337_v18 = vmul.f32 %v1289_v5, %v336_v13  ;;  %v338_v19 = vmul.f32 %v1291_v6, %v336_v13  ;;  %v342_v20 = vstv %s1271_s19  ;;  %s1346_s19 = sld [smem:[#allocation7 + $0x103]]  ;;  %s1349_s30 = sld [smem:[#allocation10 + $0x2]] }
  0x72   : > { %v333_v21 = vadd.f32 %v331_v16, %v327_v14  ;;  %v343_v23 = vmul.f32 %v1297_v10, %v342_v20  ;;  %v344_v24 = vmul.f32 %v1299_v11, %v342_v20  ;;  %v368_v28 = vstv %s1283_s12  ;;  %s1358_s9 = sld [smem:[#allocation7 + $0x183]]  ;;  %s1365_s12 = sld [smem:[#allocation7 + $0x4]] }
  0x73   : > { %v334_v22 = vadd.f32 %v332_v17, %v328_v15  ;;  %v363_v33 = vmul.f32 %v1285_v2, %v362_v27  ;;  %v364_v34 = vmul.f32 %v1287_v3, %v362_v27  ;;  %v369_v35 = vmul.f32 %v1289_v5, %v368_v28  ;;  %s1360_s10 = sld [smem:[#allocation10 + $0x3]]  ;;  %p1607_p12 = scmp.ne.s32.totalorder %s1596_s6, 0 }
  0x74   : > { %v339_v29 = vadd.f32 %v337_v18, %v333_v21  ;;  %v370_v36 = vmul.f32 %v1291_v6, %v368_v28  ;;  %v359_v39 = vadd.f32 %v358_v26, %v355_v31  ;;  %v360_v40 = vadd.f32 %v358_v26, %v356_v32 }
  0x75   : > { %v340_v30 = vadd.f32 %v338_v19, %v334_v22  ;;  %v350_v41 = vstv %s1295_s13  ;;  %v374_v42 = vstv %s1301_s14  ;;  %v388_v43 = vstv %s1303_s15  ;;  %s1367_s13 = sld [smem:[#allocation8 + $0x4]] }
  0x76   : > { %v345_v37 = vadd.f32 %v343_v23, %v339_v29  ;;  %v365_v45 = vadd.f32 %v363_v33, %v359_v39  ;;  %v366_v46 = vadd.f32 %v364_v34, %v360_v40  ;;  %v392_v47 = vstv %s1307_s17  ;;  %s1374_s14 = sld [smem:[#allocation7 + $0x84]] }
  0x77   : > { %v346_v38 = vadd.f32 %v344_v24, %v340_v30  ;;  %v375_v48 = vmul.f32 %v1297_v10, %v374_v42  ;;  %v376_v49 = vmul.f32 %v1299_v11, %v374_v42  ;;  %v389_v50 = vmul.f32 %v388_v43, %v1273_v0  ;;  %s1376_s15 = sld [smem:[#allocation7 + $0x104]] }
  0x78   : > { %v347_v44 = vmax.f32 %v345_v37, 0.0  ;;  %v390_v51 = vmul.f32 %v388_v43, %v1275_v1  ;;  %v371_v53 = vadd.f32 %v369_v35, %v365_v45  ;;  %v372_v54 = vadd.f32 %v370_v36, %v366_v46  ;;  %s1383_s17 = sld [smem:[#allocation7 + $0x184]] }
  0x79   : > { %v348_v52 = vmax.f32 %v346_v38, 0.0  ;;  %v382_v55 = vstv %s1314_s26  ;;  %v393_v56 = vadd.f32 %v392_v47, %v389_v50  ;;  %v396_v58 = vstv %s1320_s24  ;;  %s1386_s26 = sld [smem:[#allocation10 + $0x4]]  ;;  %s1391_s24 = sld [smem:[#allocation7 + $0x5]] }
  0x7a   : > { %v394_v57 = vadd.f32 %v392_v47, %v390_v51  ;;  %v402_v59 = vstv %s1322_s27  ;;  %v377_v60 = vadd.f32 %v375_v48, %v371_v53  ;;  %v378_v61 = vadd.f32 %v376_v49, %v372_v54  ;;  %s1393_s27 = sld [smem:[#allocation8 + $0x5]] }
  0x7b   : > { %v397_v62 = vmul.f32 %v1285_v2, %v396_v58  ;;  %v398_v63 = vmul.f32 %v1287_v3, %v396_v58  ;;  %v351_v4 = vmul.f32 %v350_v41, %v347_v44  ;;  %v403_v7 = vmul.f32 %v1289_v5, %v402_v59 }
  0x7c   : > { %v404_v8 = vmul.f32 %v1291_v6, %v402_v59  ;;  %v408_v9 = vstv %s1330_s29  ;;  %v379_v12 = vmax.f32 %v377_v60, 0.0  ;;  %v380_v13 = vmax.f32 %v378_v61, 0.0  ;;  %s1399_s29 = sld [smem:[#allocation7 + $0x85]] }
  0x7d   : > { %v399_v14 = vadd.f32 %v397_v62, %v393_v56  ;;  %v400_v15 = vadd.f32 %v398_v63, %v394_v57  ;;  %v352_v16 = vmul.f32 %v350_v41, %v348_v52  ;;  %v409_v17 = vmul.f32 %v1297_v10, %v408_v9 }
  0x7e   : > { %v410_v18 = vmul.f32 %v1299_v11, %v408_v9  ;;  %v422_v19 = vstv %s1335_s8  ;;  %v383_v20 = vmul.f32 %v382_v55, %v379_v12  ;;  %v426_v23 = vstv %s1338_s11  ;;  %s1401_s8 = sld [smem:[#allocation7 + $0x105]] }
  0x7f   : > { %v405_v21 = vadd.f32 %v403_v7, %v399_v14  ;;  %v406_v22 = vadd.f32 %v404_v8, %v400_v15  ;;  %v423_v24 = vmul.f32 %v422_v19, %v1273_v0  ;;  %v424_v25 = vmul.f32 %v422_v19, %v1275_v1  ;;  %s1409_s11 = sld [smem:[#allocation7 + $0x185]] }
  0x80   : > { %v430_v26 = vstv %s1344_s16  ;;  %v436_v27 = vstv %s1346_s19  ;;  %v384_v28 = vmul.f32 %v382_v55, %v380_v13  ;;  %v416_v31 = vstv %s1349_s30  ;;  %s1412_s16 = sld [smem:[#allocation10 + $0x5]]  ;;  %s1417_s19 = sld [smem:[#allocation7 + $0x6]] }
  0x81   : > { %v411_v29 = vadd.f32 %v409_v17, %v405_v21  ;;  %v412_v30 = vadd.f32 %v410_v18, %v406_v22  ;;  %v427_v32 = vadd.f32 %v426_v23, %v423_v24  ;;  %v428_v33 = vadd.f32 %v426_v23, %v424_v25  ;;  %s1419_s30 = sld [smem:[#allocation8 + $0x6]] }
  0x82   : > { %v431_v34 = vmul.f32 %v1285_v2, %v430_v26  ;;  %v432_v35 = vmul.f32 %v1287_v3, %v430_v26  ;;  %v437_v38 = vmul.f32 %v1289_v5, %v436_v27  ;;  %v438_v39 = vmul.f32 %v1291_v6, %v436_v27 }
  0x83   : > { %v413_v36 = vmax.f32 %v411_v29, 0.0  ;;  %v414_v37 = vmax.f32 %v412_v30, 0.0  ;;  %v385_v40 = vadd.f32 %v383_v20, %v351_v4  ;;  %v442_v43 = vstv %s1358_s9  ;;  %s1425_s9 = sld [smem:[#allocation7 + $0x86]] }
  0x84   : > { %v433_v41 = vadd.f32 %v431_v34, %v427_v32  ;;  %v434_v42 = vadd.f32 %v432_v35, %v428_v33  ;;  %v386_v44 = vadd.f32 %v384_v28, %v352_v16  ;;  %v443_v45 = vmul.f32 %v1297_v10, %v442_v43 }
  0x85   : > { %v444_v46 = vmul.f32 %v1299_v11, %v442_v43  ;;  %v450_v47 = vstv %s1360_s10  ;;  %v456_v50 = vstv %s1365_s12  ;;  %v460_v51 = vstv %s1367_s13  ;;  %s1427_s10 = sld [smem:[#allocation7 + $0x106]] }
  0x86   : > { %v439_v48 = vadd.f32 %v437_v38, %v433_v41  ;;  %v440_v49 = vadd.f32 %v438_v39, %v434_v42  ;;  %v417_v52 = vmul.f32 %v416_v31, %v413_v36  ;;  %v418_v53 = vmul.f32 %v416_v31, %v414_v37  ;;  %s1435_s12 = sld [smem:[#allocation7 + $0x186]] }
  0x87   : > { %v457_v54 = vmul.f32 %v456_v50, %v1273_v0  ;;  %v458_v55 = vmul.f32 %v456_v50, %v1275_v1  ;;  %v464_v58 = vstv %s1374_s14  ;;  %v470_v59 = vstv %s1376_s15  ;;  %s1438_s13 = sld [smem:[#allocation10 + $0x6]]  ;;  %s1443_s14 = sld [smem:[#allocation7 + $0x7]] }
  0x88   : > { %v445_v56 = vadd.f32 %v443_v45, %v439_v48  ;;  %v446_v57 = vadd.f32 %v444_v46, %v440_v49  ;;  %v465_v62 = vmul.f32 %v1285_v2, %v464_v58  ;;  %v466_v63 = vmul.f32 %v1287_v3, %v464_v58  ;;  %s1445_s15 = sld [smem:[#allocation8 + $0x7]] }
  0x89   : > { %v461_v60 = vadd.f32 %v460_v51, %v457_v54  ;;  %v462_v61 = vadd.f32 %v460_v51, %v458_v55  ;;  %v471_v8 = vmul.f32 %v1289_v5, %v470_v59  ;;  %v472_v9 = vmul.f32 %v1291_v6, %v470_v59 }
  0x8a   : > { %v447_v4 = vmax.f32 %v445_v56, 0.0  ;;  %v448_v7 = vmax.f32 %v446_v57, 0.0  ;;  %v419_v12 = vadd.f32 %v417_v52, %v385_v40  ;;  %v476_v15 = vstv %s1383_s17  ;;  %s1451_s17 = sld [smem:[#allocation7 + $0x87]] }
  0x8b   : > { %v467_v13 = vadd.f32 %v465_v62, %v461_v60  ;;  %v468_v14 = vadd.f32 %v466_v63, %v462_v61  ;;  %v420_v16 = vadd.f32 %v418_v53, %v386_v44  ;;  %v477_v17 = vmul.f32 %v1297_v10, %v476_v15 }
  0x8c   : > { %v478_v18 = vmul.f32 %v1299_v11, %v476_v15  ;;  %v484_v19 = vstv %s1386_s26  ;;  %v490_v22 = vstv %s1391_s24  ;;  %v494_v23 = vstv %s1393_s27  ;;  %s1453_s26 = sld [smem:[#allocation7 + $0x107]] }
  0x8d   : > { %v473_v20 = vadd.f32 %v471_v8, %v467_v13  ;;  %v474_v21 = vadd.f32 %v472_v9, %v468_v14  ;;  %v451_v24 = vmul.f32 %v450_v47, %v447_v4  ;;  %v452_v25 = vmul.f32 %v450_v47, %v448_v7  ;;  %s1461_s24 = sld [smem:[#allocation7 + $0x187]] }
  0x8e   : > { %v491_v26 = vmul.f32 %v490_v22, %v1273_v0  ;;  %v492_v27 = vmul.f32 %v490_v22, %v1275_v1  ;;  %v498_v30 = vstv %s1399_s29  ;;  %v504_v31 = vstv %s1401_s8  ;;  %s1464_s27 = sld [smem:[#allocation10 + $0x7]]  ;;  %s1469_s29 = sld [smem:[#allocation7 + $0x8]] }
  0x8f   : > { %v479_v28 = vadd.f32 %v477_v17, %v473_v20  ;;  %v480_v29 = vadd.f32 %v478_v18, %v474_v21  ;;  %v499_v34 = vmul.f32 %v1285_v2, %v498_v30  ;;  %v500_v35 = vmul.f32 %v1287_v3, %v498_v30  ;;  %s1471_s8 = sld [smem:[#allocation8 + $0x8]] }
  0x90   : > { %v495_v32 = vadd.f32 %v494_v23, %v491_v26  ;;  %v496_v33 = vadd.f32 %v494_v23, %v492_v27  ;;  %v505_v38 = vmul.f32 %v1289_v5, %v504_v31  ;;  %v506_v39 = vmul.f32 %v1291_v6, %v504_v31 }
  0x91   : > { %v481_v36 = vmax.f32 %v479_v28, 0.0  ;;  %v482_v37 = vmax.f32 %v480_v29, 0.0  ;;  %v453_v40 = vadd.f32 %v451_v24, %v419_v12  ;;  %v510_v43 = vstv %s1409_s11  ;;  %s1477_s11 = sld [smem:[#allocation7 + $0x88]] }
  0x92   : > { %v501_v41 = vadd.f32 %v499_v34, %v495_v32  ;;  %v502_v42 = vadd.f32 %v500_v35, %v496_v33  ;;  %v454_v44 = vadd.f32 %v452_v25, %v420_v16  ;;  %v511_v45 = vmul.f32 %v1297_v10, %v510_v43 }
  0x93   : > { %v512_v46 = vmul.f32 %v1299_v11, %v510_v43  ;;  %v518_v47 = vstv %s1412_s16  ;;  %v524_v50 = vstv %s1417_s19  ;;  %v528_v51 = vstv %s1419_s30  ;;  %s1479_s16 = sld [smem:[#allocation7 + $0x108]] }
  0x94   : > { %v507_v48 = vadd.f32 %v505_v38, %v501_v41  ;;  %v508_v49 = vadd.f32 %v506_v39, %v502_v42  ;;  %v485_v52 = vmul.f32 %v484_v19, %v481_v36  ;;  %v486_v53 = vmul.f32 %v484_v19, %v482_v37  ;;  %s1487_s19 = sld [smem:[#allocation7 + $0x188]] }
  0x95   : > { %v525_v54 = vmul.f32 %v524_v50, %v1273_v0  ;;  %v526_v55 = vmul.f32 %v524_v50, %v1275_v1  ;;  %v532_v58 = vstv %s1425_s9  ;;  %v538_v59 = vstv %s1427_s10  ;;  %s1490_s30 = sld [smem:[#allocation10 + $0x8]]  ;;  %s1495_s9 = sld [smem:[#allocation7 + $0x9]] }
  0x96   : > { %v513_v56 = vadd.f32 %v511_v45, %v507_v48  ;;  %v514_v57 = vadd.f32 %v512_v46, %v508_v49  ;;  %v533_v62 = vmul.f32 %v1285_v2, %v532_v58  ;;  %v534_v63 = vmul.f32 %v1287_v3, %v532_v58  ;;  %s1497_s10 = sld [smem:[#allocation8 + $0x9]] }
  0x97   : > { %v529_v60 = vadd.f32 %v528_v51, %v525_v54  ;;  %v530_v61 = vadd.f32 %v528_v51, %v526_v55  ;;  %v539_v8 = vmul.f32 %v1289_v5, %v538_v59  ;;  %v540_v9 = vmul.f32 %v1291_v6, %v538_v59 }
  0x98   : > { %v515_v4 = vmax.f32 %v513_v56, 0.0  ;;  %v516_v7 = vmax.f32 %v514_v57, 0.0  ;;  %v487_v12 = vadd.f32 %v485_v52, %v453_v40  ;;  %v544_v15 = vstv %s1435_s12  ;;  %s1503_s12 = sld [smem:[#allocation7 + $0x89]] }
  0x99   : > { %v535_v13 = vadd.f32 %v533_v62, %v529_v60  ;;  %v536_v14 = vadd.f32 %v534_v63, %v530_v61  ;;  %v488_v16 = vadd.f32 %v486_v53, %v454_v44  ;;  %v545_v17 = vmul.f32 %v1297_v10, %v544_v15 }
  0x9a   : > { %v546_v18 = vmul.f32 %v1299_v11, %v544_v15  ;;  %v552_v19 = vstv %s1438_s13  ;;  %v558_v22 = vstv %s1443_s14  ;;  %v562_v23 = vstv %s1445_s15  ;;  %s1505_s13 = sld [smem:[#allocation7 + $0x109]] }
  0x9b   : > { %v541_v20 = vadd.f32 %v539_v8, %v535_v13  ;;  %v542_v21 = vadd.f32 %v540_v9, %v536_v14  ;;  %v519_v24 = vmul.f32 %v518_v47, %v515_v4  ;;  %v520_v25 = vmul.f32 %v518_v47, %v516_v7  ;;  %s1513_s14 = sld [smem:[#allocation7 + $0x189]] }
  0x9c   : > { %v559_v26 = vmul.f32 %v558_v22, %v1273_v0  ;;  %v560_v27 = vmul.f32 %v558_v22, %v1275_v1  ;;  %v566_v30 = vstv %s1451_s17  ;;  %v572_v31 = vstv %s1453_s26  ;;  %s862_s15 = sld [smem:[#allocation10 + $0x9]]  ;;  %s659_s17 = sld [smem:[#allocation2]] }
  0x9d   : > { %v547_v28 = vadd.f32 %v545_v17, %v541_v20  ;;  %v548_v29 = vadd.f32 %v546_v18, %v542_v21  ;;  %v567_v34 = vmul.f32 %v1285_v2, %v566_v30  ;;  %v568_v35 = vmul.f32 %v1287_v3, %v566_v30  ;;  %s799_s26 = sshll.u32 %s1255_s18, 4 }
  0x9e   : > { %v563_v32 = vadd.f32 %v562_v23, %v559_v26  ;;  %v564_v33 = vadd.f32 %v562_v23, %v560_v27  ;;  %v573_v38 = vmul.f32 %v1289_v5, %v572_v31  ;;  %v574_v39 = vmul.f32 %v1291_v6, %v572_v31 }
  0x9f   : > { %v549_v36 = vmax.f32 %v547_v28, 0.0  ;;  %v550_v37 = vmax.f32 %v548_v29, 0.0  ;;  %v521_v40 = vadd.f32 %v519_v24, %v487_v12  ;;  %v578_v43 = vstv %s1461_s24  ;;  %s869_s24 = sshll.u32 %s1144_s4, 8  ;;  %s666_s4 = scalar_lea.sflag [#allocation5], %s1255_s18 }
  0xa0   : > { %v569_v41 = vadd.f32 %v567_v34, %v563_v32  ;;  %v570_v42 = vadd.f32 %v568_v35, %v564_v33  ;;  %v522_v44 = vadd.f32 %v520_v25, %v488_v16  ;;  %v579_v45 = vmul.f32 %v1297_v10, %v578_v43 }
  0xa1   : > { %v580_v46 = vmul.f32 %v1299_v11, %v578_v43  ;;  %v586_v47 = vstv %s1464_s27  ;;  %v592_v50 = vstv %s1469_s29  ;;  %v596_v51 = vstv %s1471_s8  ;;  %s307_s27 = scalar_lea.vmem [#allocation11], %s799_s26 }
  0xa2   : > { %v575_v48 = vadd.f32 %v573_v38, %v569_v41  ;;  %v576_v49 = vadd.f32 %v574_v39, %v570_v42  ;;  %v553_v52 = vmul.f32 %v552_v19, %v549_v36  ;;  %v554_v53 = vmul.f32 %v552_v19, %v550_v37  ;;  %s679_s29 = sshll.u32 %s307_s27, 4  ;;  %s1539_s29 = int_to_ptr.vmem [resolvable:$true] %s679_s29 }
  0xa3   : > { %v593_v54 = vmul.f32 %v592_v50, %v1273_v0  ;;  %v594_v55 = vmul.f32 %v592_v50, %v1275_v1  ;;  %v600_v58 = vstv %s1477_s11  ;;  %v606_v59 = vstv %s1479_s16  ;;  %s1537_s16 = scalar_lea.hbm %s1588_s5, %s869_s24 }
  0xa4   : > { %v581_v56 = vadd.f32 %v579_v45, %v575_v48  ;;  %v582_v57 = vadd.f32 %v580_v46, %v576_v49  ;;  %v601_v62 = vmul.f32 %v1285_v2, %v600_v58  ;;  %v602_v63 = vmul.f32 %v1287_v3, %v600_v58 }
  0xa5   : > { %v597_v60 = vadd.f32 %v596_v51, %v593_v54  ;;  %v598_v61 = vadd.f32 %v596_v51, %v594_v55  ;;  %v607_v8 = vmul.f32 %v1289_v5, %v606_v59  ;;  %v608_v9 = vmul.f32 %v1291_v6, %v606_v59 }
  0xa6   : > { %v583_v4 = vmax.f32 %v581_v56, 0.0  ;;  %v584_v7 = vmax.f32 %v582_v57, 0.0  ;;  %v555_v12 = vadd.f32 %v553_v52, %v521_v40  ;;  %v612_v15 = vstv %s1487_s19  ;;  %s1002_s19 = scalar_lea.vmem %s1539_s29, 256 }
  0xa7   : > { %v603_v13 = vadd.f32 %v601_v62, %v597_v60  ;;  %v604_v14 = vadd.f32 %v602_v63, %v598_v61  ;;  %v556_v16 = vadd.f32 %v554_v53, %v522_v44  ;;  %v613_v17 = vmul.f32 %v1297_v10, %v612_v15  ;;  %p1003_p8 = scmp.ne.s32.totalorder %s1539_s29, %s1002_s19 }
  0xa8   : > { %v614_v18 = vmul.f32 %v1299_v11, %v612_v15  ;;  %v620_v19 = vstv %s1490_s30  ;;  %v626_v22 = vstv %s1495_s9  ;;  %v630_v23 = vstv %s1497_s10  ;;  %s1087_s30 = smov [#allocation11]  }
  0xa9   : > { %v609_v20 = vadd.f32 %v607_v8, %v603_v13  ;;  %v610_v21 = vadd.f32 %v608_v9, %v604_v14  ;;  %v587_v24 = vmul.f32 %v586_v47, %v583_v4  ;;  %v588_v25 = vmul.f32 %v586_v47, %v584_v7  ;;  %p1004_p11 = pnand %p1003_p8, %p1607_p12  ;;  %s1006_s9 = sshll.u32 %s1087_s30, 4  ;;  %s1007_s9 = int_to_ptr.vmem [resolvable:$false] %s1006_s9 }
  0xaa   : > { %v627_v26 = vmul.f32 %v626_v22, %v1273_v0  ;;  %v628_v27 = vmul.f32 %v626_v22, %v1275_v1  ;;  %v634_v30 = vstv %s1503_s12  ;;  %v640_v31 = vstv %s1505_s13  ;;  %s1008_s10 = scalar_lea.vmem %s1007_s9, 512  ;;  %p1009_p5 = scmp.lt.s32.totalorder %s1539_s29, %s1007_s9 }
  0xab   : > { %v615_v28 = vadd.f32 %v613_v17, %v609_v20  ;;  %v616_v29 = vadd.f32 %v614_v18, %v610_v21  ;;  %v635_v34 = vmul.f32 %v1285_v2, %v634_v30  ;;  %v636_v35 = vmul.f32 %v1287_v3, %v634_v30  ;;  %p1005_p9 = pneg %p1004_p11  ;;  %p1010_p6 = scmp.lt.s32.totalorder %s1008_s10, %s1002_s19 }
  0xac   : > { %v631_v32 = vadd.f32 %v630_v23, %v627_v26  ;;  %v632_v33 = vadd.f32 %v630_v23, %v628_v27  ;;  %v641_v38 = vmul.f32 %v1289_v5, %v640_v31  ;;  %v642_v0 = vmul.f32 %v1291_v6, %v640_v31 }
  0xad   : > { %v617_v36 = vmax.f32 %v615_v28, 0.0  ;;  %v618_v37 = vmax.f32 %v616_v29, 0.0  ;;  %v646_v40 = vstv %s1513_s14  ;;  %v589_v41 = vadd.f32 %v587_v24, %v555_v12  ;;  %p1011_p0 = por %p1010_p6, %p1009_p5 }
  0xae   : > { %v637_v1 = vadd.f32 %v635_v34, %v631_v32  ;;  %v638_v39 = vadd.f32 %v636_v35, %v632_v33  ;;  %v590_v42 = vadd.f32 %v588_v25, %v556_v16  ;;  %v647_v43 = vmul.f32 %v1297_v10, %v646_v40 }
  0xaf   : > { %v648_v44 = vmul.f32 %v1299_v11, %v646_v40  ;;  %v621_v2 = vmul.f32 %v620_v19, %v617_v36  ;;  %v622_v3 = vmul.f32 %v620_v19, %v618_v37  ;;  %v654_v48 = vstv %s862_s15  ;;  %p1012_p3 = pnand %p1011_p0, %p1005_p9 }
  0xb0   : > { %v643_v45 = vadd.f32 %v641_v38, %v637_v1  ;;  %v644_v46 = vadd.f32 %v642_v0, %v638_v39  ;;  %v660_v10 = vstv %s659_s17 }
  0xb1   : > { %v623_v6 = vadd.f32 %v621_v2, %v589_v41  ;;  %v624_v49 = vadd.f32 %v622_v3, %v590_v42 }
  0xb2   : > { %v649_v47 = vadd.f32 %v647_v43, %v643_v45  ;;  %v650_v5 = vadd.f32 %v648_v44, %v644_v46 }
  0xb4   : > { %v651_v50 = vmax.f32 %v649_v47, 0.0  ;;  %v652_v51 = vmax.f32 %v650_v5, 0.0 }
  0xb6   : > { %v655_v52 = vmul.f32 %v654_v48, %v651_v50  ;;  %v656_v53 = vmul.f32 %v654_v48, %v652_v51 }
  0xb8   : > { %v657_v11 = vadd.f32 %v655_v52, %v623_v6  ;;  %v658_v54 = vadd.f32 %v656_v53, %v624_v49 }
  0xba   : > { %v661_v55 = vadd.f32 %v660_v10, %v657_v11  ;;  %v662_v56 = vadd.f32 %v660_v10, %v658_v54 }
  0xbc   : > { %663 = vst [vmem:[%s307_s27] sm:$0xff] %v661_v55  ;;  %664 = vst [vmem:[%s307_s27 + $0x8] sm:$0xff] %v662_v56 }
  0xbd   : > { %1015 = shalt.err (!%p1012_p3)
}
  0xbe   : > { %s1016_s12 = scalar_lea.hbm %s1537_s16, 256  ;;  %s1020_s15 = scalar_lea.hbm %s1588_s5, 512 }
  0xbf   : > { %p1017_p10 = scmp.ne.s32.totalorder %s1537_s16, %s1016_s12  ;;  %p1021_p7 = scmp.lt.u32.totalorder %s1537_s16, %s1588_s5 }
  0xc0   : > { %p1022_p4 = scmp.lt.u32.totalorder %s1020_s15, %s1016_s12  ;;  %p1024_p11 = scmp.lt.u32.totalorder %s1016_s12, %s1537_s16 }
  0xc1   : > { %p1018_p1 = pnand %p1017_p10, %p1607_p12 }
  0xc2   : > { %p1023_p8 = por %p1022_p4, %p1021_p7 }
  0xc3   : > { %p1019_p2 = pneg %p1018_p1 }
  0xc4   : > { %p1025_p9 = por %p1024_p11, %p1023_p8 }
  0xc6   : > { %p1026_p5 = pnand %p1025_p9, %p1019_p2 }
  0xc8   : > { %1029 = shalt.err (!%p1026_p5)
}
  0xc9   : > { %s1088_s24 = smov 128   ;;  %s1089_s27 = smov 8  }
  0xca   : > { %891 = dma.vmem_to_hbm [thread:$0]  (%p1607_p12), %s1539_s29, 256, %s1537_s16, %s666_s4, %s1088_s24, %s1088_s24, %s1089_s27  }
  0xcb PF: > { %s694_s8 = sand.u32 1, %s1064_s20   ;;  %p1608_p6 = scmp.ne.s32.totalorder %s1597_s7, 0 }
  0xcc   : > { %s695_s11 = scalar_lea.sflag [#allocation5], %s694_s8 }
  0xcd   : > { %p904_p0 = pnand %p788_p13, %p1608_p6 }
  0xcf   : > { %1059 = dma.done.wait (!%p904_p0), %s695_s11, 256  }
  0xd0   : > { %1061 = vsyncadd (!%p904_p0), %s695_s11, 4294967040  ;;  %p21_p3 = scmp.ge.s32.totalorder %s1148_s25, 4   ;;  %s1609_s20 = smov %s1068_s21 }
  0xd1   : > { %s1610_s21 = smov %s1072_s22  ;;  %s1611_s22 = smov %s1160_s28 }
  0xd2   : > { %s1612_s23 = smov %s1148_s25  ;;  %23 = sbr.rel (!%p21_p3) target bundleno = 9 (0x9), region = 106 }
  0xd9   :  { %700 = vsyncpa [#allocation4], 1 }
  0xda   :  { %702 = vsyncpa [#allocation4 + $0x1], 1 }
  0xdb   :  { %703 = vsyncpa [#allocation5], 1 }
  0xdc   :  { %705 = vsyncpa [#allocation5 + $0x1], 1 }
  0xdd   :  { %706 = vsyncpa [#allocation6], 1 }
  0xde   :  { %708 = vsyncpa [#allocation6 + $0x1], 1 }
  0xdf   :  { %709 = vsyncpa [#allocation9], 1 }

</bundles_post_ra>
